<compile_context>
chip_gen: v5e
topology: v5e:2x2
jax: 0.10.0
libtpu: 0.0.40
codegen_flags: <defaults>
</compile_context>

<pallas_src>
import functools

import jax
import jax.numpy as jnp
from jax.experimental import pallas as pl
from jax.experimental.pallas import tpu as pltpu


def _round_up(n: int, m: int) -> int:
    return ((n + m - 1) // m) * m


# ----------------------------------------------------------------------------
# Kernel
# ----------------------------------------------------------------------------
def dc_mlp_kernel(x_ref, w1_ref, b1_ref, w2_ref, b2_ref, w3_ref, b3_ref, o_ref,
                  *, pack: bool):
    x = x_ref[...]

    # --- layer 1 + ReLU -------------------------------------------------------
    if x.shape[1] == 1:
        # K == 1: (tm,1) @ (1,H) is a degenerate outer product; do it on the
        # VPU as a broadcast multiply instead of a 1-deep MXU pass.
        h = x * w1_ref[...] + b1_ref[...]
    else:
        h = jnp.dot(x, w1_ref[...], preferred_element_type=jnp.float32) + b1_ref[...]
    h = jnp.maximum(h, 0.0)

    # --- layer 2 + ReLU (MXU, f32 accumulation; weights may be bf16) -----------
    h = jnp.dot(h.astype(w2_ref.dtype), w2_ref[...],
                preferred_element_type=jnp.float32) + b2_ref[...]
    h = jnp.maximum(h, 0.0)

    # --- layer 3 + sigmoid ------------------------------------------------------
    z = jnp.dot(h.astype(w3_ref.dtype), w3_ref[...],
                preferred_element_type=jnp.float32)          # (tm, n8)
    if pack:
        # Repack the narrow result lane-densely: (tm, n8) -> (tm*n8//128, 128),
        # so bias/sigmoid/store run on ~n8/128 as many vregs.  Bias was
        # pre-tiled along lanes in pad_params to match this layout.
        z = z.reshape(o_ref.shape) + b3_ref[...]
    else:
        z = z + b3_ref[...][:, : z.shape[1]]
    o_ref[...] = jax.nn.sigmoid(z).astype(o_ref.dtype)


# ----------------------------------------------------------------------------
# Parameter preparation (runs ONCE, outside the per-call forward)
# ----------------------------------------------------------------------------
def pad_params(params, use_bf16: bool = False):
    """Zero-pads weights/biases to TPU-friendly shapes.  Called once; the
    padded tuple is reused by every forward call (padding hoisted out of jit).

    use_bf16: cast layer-2/3 weights to bf16 (f32 accumulation in-kernel).
    Off by default: it would exceed the 1e-5 test tolerance."""
    w1, b1, w2, b2, w3, b3 = params
    in_dim, hidden = w1.shape
    n_turbines = w3.shape[1]

    Hp = _round_up(hidden, 128)
    # Output feature padding: smallest power-of-two width >= n_turbines that
    # tiles 128 exactly (enables the lane-dense repack); if n_turbines > 128
    # it is already lane-dense once rounded to a multiple of 128.
    if n_turbines <= 128:
        n8 = 8
        while n8 < n_turbines:
            n8 *= 2
    else:
        n8 = _round_up(n_turbines, 128)

    wdt = jnp.bfloat16 if use_bf16 else jnp.float32
    b1 = jnp.asarray(b1).reshape(1, -1)
    b2 = jnp.asarray(b2).reshape(1, -1)
    b3 = jnp.asarray(b3).reshape(1, -1)

    w1p = jnp.zeros((in_dim, Hp), jnp.float32).at[:, :hidden].set(w1)
    b1p = jnp.zeros((1, Hp), jnp.float32).at[:, :hidden].set(b1)
    w2p = jnp.zeros((Hp, Hp), jnp.float32).at[:hidden, :hidden].set(w2).astype(wdt)
    b2p = jnp.zeros((1, Hp), jnp.float32).at[:, :hidden].set(b2)
    w3p = jnp.zeros((Hp, n8), jnp.float32).at[:hidden, :n_turbines].set(w3).astype(wdt)
    b3_pad = jnp.zeros((1, n8), jnp.float32).at[:, :n_turbines].set(b3)
    # Lane-tile the output bias so the packed kernel can add it directly to the
    # (tm*n8//128, 128) slab; the unpacked kernel just uses the first n8 lanes.
    b3p = jnp.tile(b3_pad, (1, 128 // n8)) if n8 < 128 else b3_pad
    return (w1p, b1p, w2p, b2p, w3p, b3p)


# ----------------------------------------------------------------------------
# Forward
# ----------------------------------------------------------------------------
_TM_UNIT = 128  # keeps hidden tiles lane-dense and the packed-output reshape legal


@functools.partial(jax.jit, static_argnames=("n_turbines", "tile_m", "pack_output"))
def dc_model_forward(x, padded_params, *, n_turbines: int, tile_m: int = 4096,
                     pack_output: bool = True):
    """x: (B, input_size) f32; padded_params from pad_params().
    Returns (B, n_turbines) f32."""
    w1p, b1p, w2p, b2p, w3p, b3p = padded_params
    B, in_dim = x.shape
    Hp = w1p.shape[1]
    n8 = w3p.shape[1]
    pack = bool(pack_output) and n8 < 128 and (128 % n8 == 0)

    # ---- adaptive batch tiling: big tiles, >=2 grid steps for v7x's two TCs,
    #      and no near-2x padding blow-up for B slightly above tile_m.
    tile_m = max(_TM_UNIT, _round_up(tile_m, _TM_UNIT))
    n_tiles = max(1, -(-B // tile_m))
    if n_tiles == 1 and B >= 2 * _TM_UNIT:
        n_tiles = 2
    tm = _round_up(-(-B // n_tiles), _TM_UNIT)
    Bp = tm * n_tiles
    xp = x if Bp == B else jnp.zeros((Bp, in_dim), x.dtype).at[:B, :].set(x)

    # ---- output layout
    if pack:
        lpg = 128 // n8                       # batch rows folded per output row
        out_block = (tm // lpg, 128)
        out_shape = jax.ShapeDtypeStruct((Bp // lpg, 128), jnp.float32)
    else:
        out_block = (tm, n8)
        out_shape = jax.ShapeDtypeStruct((Bp, n8), jnp.float32)

    # ---- VMEM headroom only when very large tiles are requested (v5e default
    #      scoped limit is 16 MiB; default tile_m=4096 stays well inside it).
    vmem_est = 4 * (3 * tm * Hp + 2 * (tm * in_dim + out_block[0] * out_block[1])
                    + 2 * (Hp * Hp + Hp * n8 + 3 * 128))
    cp = dict(dimension_semantics=("parallel",))
    if vmem_est > 12 * (1 << 20):
        cp["vmem_limit_bytes"] = min(int(vmem_est * 3 // 2), 64 * (1 << 20))

    out = pl.pallas_call(
        functools.partial(dc_mlp_kernel, pack=pack),
        out_shape=out_shape,
        grid_spec=pltpu.PrefetchScalarGridSpec(
            num_scalar_prefetch=0,
            grid=(n_tiles,),
            in_specs=[
                pl.BlockSpec((tm, in_dim), lambda i: (i, 0)),   # batch-tiled input
                pl.BlockSpec(w1p.shape, lambda i: (0, 0)),      # resident weights
                pl.BlockSpec(b1p.shape, lambda i: (0, 0)),
                pl.BlockSpec(w2p.shape, lambda i: (0, 0)),
                pl.BlockSpec(b2p.shape, lambda i: (0, 0)),
                pl.BlockSpec(w3p.shape, lambda i: (0, 0)),
                pl.BlockSpec(b3p.shape, lambda i: (0, 0)),
            ],
            out_specs=pl.BlockSpec(out_block, lambda i: (i, 0)),
        ),
        compiler_params=pltpu.CompilerParams(**cp),
    )(xp, w1p, b1p, w2p, b2p, w3p, b3p)

    if pack:
        out = out.reshape(Bp, n8)             # free row-major un-packing
    return out[:B, :n_turbines]


# Cached decision: does the lane-dense in-kernel repack lower on this Mosaic?
_PACK_OK = None


def dc_model_forward_auto(x, padded_params, *, n_turbines: int, tile_m: int = 4096):
    """Tries the packed (lane-dense output) kernel first and falls back to the
    narrow-output kernel if the in-kernel relayout fails to compile."""
    global _PACK_OK
    n8 = padded_params[4].shape[1]
    if n8 >= 128:
        return dc_model_forward(x, padded_params, n_turbines=n_turbines,
                                tile_m=tile_m, pack_output=False)
    if _PACK_OK is None:
        try:
            out = dc_model_forward(x, padded_params, n_turbines=n_turbines,
                                   tile_m=tile_m, pack_output=True)
            jax.block_until_ready(out)
            _PACK_OK = True
            return out
        except Exception:
            # Mosaic could not lower the (tm, n8)->(tm*n8//128, 128) relayout;
            # the narrow-output path is still 16x less HBM traffic than before.
            _PACK_OK = False
    return dc_model_forward(x, padded_params, n_turbines=n_turbines,
                            tile_m=tile_m, pack_output=_PACK_OK)


# ----------------------------------------------------------------------------
# Init + reference
# ----------------------------------------------------------------------------
def init_params(key, input_size, hidden_dim, n_turbines):
    """Deterministic init mimicking nn.Linear's U(-1/sqrt(fan_in), 1/sqrt(fan_in))."""
    ks = jax.random.split(key, 6)

    def lin(kw, kb, fan_in, fan_out):
        bound = 1.0 / jnp.sqrt(fan_in)
        w = jax.random.uniform(kw, (fan_in, fan_out), jnp.float32, -bound, bound)
        b = jax.random.uniform(kb, (1, fan_out), jnp.float32, -bound, bound)
        return w, b

    w1, b1 = lin(ks[0], ks[1], input_size, hidden_dim)
    w2, b2 = lin(ks[2], ks[3], hidden_dim, hidden_dim)
    w3, b3 = lin(ks[4], ks[5], hidden_dim, n_turbines)
    return (w1, b1, w2, b2, w3, b3)


def _reference(x, params):
    w1, b1, w2, b2, w3, b3 = params
    h = jnp.maximum(x @ w1 + b1, 0.0)
    h = jnp.maximum(h @ w2 + b2, 0.0)
    return jax.nn.sigmoid(h @ w3 + b3)


if __name__ == "__main__":
    # DCModel(n_turbines=4, hidden_dim=64, dropout=False) -> input_size = 1
    n_turbines = 4
    hidden_dim = 64
    input_size = 1

    key = jax.random.PRNGKey(0)
    k_x, k_p, k_x2 = jax.random.split(key, 3)
    params = init_params(k_p, input_size, hidden_dim, n_turbines)
    pparams = pad_params(params)          # pad once; hoisted out of the forward

    # Small batch.
    batch = 16
    x = jax.random.normal(k_x, (batch, input_size), jnp.float32)
    out = jax.block_until_ready(
        dc_model_forward_auto(x, pparams, n_turbines=n_turbines))
    ref = _reference(x, params)
    assert out.shape == (batch, n_turbines)
    assert jnp.allclose(out, ref, atol=1e-5, rtol=1e-5)

    # Ragged batch exercises the adaptive-tile batch-padding path.
    batch2 = 13
    x2 = jax.random.normal(k_x2, (batch2, input_size), jnp.float32)
    out2 = jax.block_until_ready(
        dc_model_forward_auto(x2, pparams, n_turbines=n_turbines))
    ref2 = _reference(x2, params)
    assert out2.shape == (batch2, n_turbines)
    assert jnp.allclose(out2, ref2, atol=1e-5, rtol=1e-5)

    # Larger batch: grid gets >= 2 "parallel" steps (both TensorCores on v7x).
    batch3 = 300
    x3 = jax.random.normal(jax.random.PRNGKey(7), (batch3, input_size), jnp.float32)
    out3 = jax.block_until_ready(
        dc_model_forward_auto(x3, pparams, n_turbines=n_turbines))
    ref3 = _reference(x3, params)
    assert out3.shape == (batch3, n_turbines)
    assert jnp.allclose(out3, ref3, atol=1e-5, rtol=1e-5)

    print("KERNEL_OK")
</pallas_src>

<mosaic_0001>
module attributes {stable_mosaic.version = 11 : i64} {
  func.func @dc_mlp_kernel(%arg0: i32, %arg1: memref<128x1xf32, #tpu.memory_space<vmem>>, %arg2: memref<1x128xf32, #tpu.memory_space<vmem>>, %arg3: memref<1x128xf32, #tpu.memory_space<vmem>>, %arg4: memref<128x128xf32, #tpu.memory_space<vmem>>, %arg5: memref<1x128xf32, #tpu.memory_space<vmem>>, %arg6: memref<128x8xf32, #tpu.memory_space<vmem>>, %arg7: memref<1x128xf32, #tpu.memory_space<vmem>>, %arg8: memref<8x128xf32, #tpu.memory_space<vmem>>) attributes {dimension_semantics = [#tpu.dimension_semantics<parallel>], iteration_bounds = array<i64: 1>, scalar_prefetch = 0 : i64, scratch_operands = 0 : i64, tpu.core_type = #tpu.core_type<tc>, window_params = [{transform_indices = @transform_0, window_bounds = array<i64: 128, 1>}, {pipeline_mode = #tpu.pipeline_mode<synchronous>, transform_indices = @transform_1, window_bounds = array<i64: 1, 128>}, {pipeline_mode = #tpu.pipeline_mode<synchronous>, transform_indices = @transform_2, window_bounds = array<i64: 1, 128>}, {pipeline_mode = #tpu.pipeline_mode<synchronous>, transform_indices = @transform_3, window_bounds = array<i64: 128, 128>}, {pipeline_mode = #tpu.pipeline_mode<synchronous>, transform_indices = @transform_4, window_bounds = array<i64: 1, 128>}, {pipeline_mode = #tpu.pipeline_mode<synchronous>, transform_indices = @transform_5, window_bounds = array<i64: 128, 8>}, {pipeline_mode = #tpu.pipeline_mode<synchronous>, transform_indices = @transform_6, window_bounds = array<i64: 1, 128>}, {transform_indices = @transform_7, window_bounds = array<i64: 8, 128>}]} {
    %c0 = arith.constant 0 : index
    %c0_0 = arith.constant 0 : index
    %0 = vector.load %arg1[%c0, %c0_0] : memref<128x1xf32, #tpu.memory_space<vmem>>, vector<128x1xf32>
    %c0_1 = arith.constant 0 : index
    %c0_2 = arith.constant 0 : index
    %1 = vector.load %arg2[%c0_1, %c0_2] : memref<1x128xf32, #tpu.memory_space<vmem>>, vector<1x128xf32>
    %2 = vector.broadcast %0 : vector<128x1xf32> to vector<128x128xf32>
    %3 = vector.broadcast %1 : vector<1x128xf32> to vector<128x128xf32>
    %4 = arith.mulf %2, %3 : vector<128x128xf32>
    %c0_3 = arith.constant 0 : index
    %c0_4 = arith.constant 0 : index
    %5 = vector.load %arg3[%c0_3, %c0_4] : memref<1x128xf32, #tpu.memory_space<vmem>>, vector<1x128xf32>
    %6 = vector.broadcast %5 : vector<1x128xf32> to vector<128x128xf32>
    %7 = arith.addf %4, %6 : vector<128x128xf32>
    %cst = arith.constant 0.000000e+00 : f32
    %8 = vector.broadcast %cst : f32 to vector<128x128xf32>
    %9 = arith.maximumf %7, %8 : vector<128x128xf32>
    %c0_5 = arith.constant 0 : index
    %c0_6 = arith.constant 0 : index
    %10 = vector.load %arg4[%c0_5, %c0_6] : memref<128x128xf32, #tpu.memory_space<vmem>>, vector<128x128xf32>
    %cst_7 = arith.constant dense<0.000000e+00> : vector<128x128xf32>
    %11 = tpu.matmul %9, %10, %cst_7 {dimension_numbers = #tpu.dot_dimension_numbers<[1], [0], [0], [1], [0, 0, 1, 1], [], []>} : vector<128x128xf32>, vector<128x128xf32>, vector<128x128xf32> -> vector<128x128xf32>
    %c0_8 = arith.constant 0 : index
    %c0_9 = arith.constant 0 : index
    %12 = vector.load %arg5[%c0_8, %c0_9] : memref<1x128xf32, #tpu.memory_space<vmem>>, vector<1x128xf32>
    %13 = vector.broadcast %12 : vector<1x128xf32> to vector<128x128xf32>
    %14 = arith.addf %11, %13 : vector<128x128xf32>
    %cst_10 = arith.constant 0.000000e+00 : f32
    %15 = vector.broadcast %cst_10 : f32 to vector<128x128xf32>
    %16 = arith.maximumf %14, %15 : vector<128x128xf32>
    %c0_11 = arith.constant 0 : index
    %c0_12 = arith.constant 0 : index
    %17 = vector.load %arg6[%c0_11, %c0_12] : memref<128x8xf32, #tpu.memory_space<vmem>>, vector<128x8xf32>
    %cst_13 = arith.constant dense<0.000000e+00> : vector<128x8xf32>
    %18 = tpu.matmul %16, %17, %cst_13 {dimension_numbers = #tpu.dot_dimension_numbers<[1], [0], [0], [1], [0, 0, 1, 1], [], []>} : vector<128x128xf32>, vector<128x8xf32>, vector<128x8xf32> -> vector<128x8xf32>
    %19 = vector.shape_cast %18 : vector<128x8xf32> to vector<8x128xf32>
    %c0_14 = arith.constant 0 : index
    %c0_15 = arith.constant 0 : index
    %20 = vector.load %arg7[%c0_14, %c0_15] : memref<1x128xf32, #tpu.memory_space<vmem>>, vector<1x128xf32>
    %21 = vector.broadcast %20 : vector<1x128xf32> to vector<8x128xf32>
    %22 = arith.addf %19, %21 : vector<8x128xf32>
    %23 = arith.negf %22 : vector<8x128xf32>
    %24 = math.exp %23 : vector<8x128xf32>
    %cst_16 = arith.constant 1.000000e+00 : f32
    %25 = vector.broadcast %cst_16 : f32 to vector<8x128xf32>
    %26 = arith.addf %25, %24 : vector<8x128xf32>
    %27 = arith.divf %25, %26 : vector<8x128xf32>
    %c0_17 = arith.constant 0 : index
    %c0_18 = arith.constant 0 : index
    %28 = vector.load %arg8[%c0_17, %c0_18] : memref<8x128xf32, #tpu.memory_space<vmem>>, vector<8x128xf32>
    tpu.vector_store %arg8[%c0_17, %c0_18], %27 {strides = array<i32>} : memref<8x128xf32, #tpu.memory_space<vmem>>, vector<8x128xf32>,
    return
  }
  func.func @transform_0(%arg0: i32) -> (i32, i32) {
    %c0_i32 = arith.constant 0 : i32
    %c0_i32_0 = arith.constant 0 : i32
    return %arg0, %c0_i32 : i32, i32
  }
  func.func @transform_1(%arg0: i32) -> (i32, i32) {
    %c0_i32 = arith.constant 0 : i32
    %c0_i32_0 = arith.constant 0 : i32
    %c0_i32_1 = arith.constant 0 : i32
    return %c0_i32, %c0_i32_0 : i32, i32
  }
  func.func @transform_2(%arg0: i32) -> (i32, i32) {
    %c0_i32 = arith.constant 0 : i32
    %c0_i32_0 = arith.constant 0 : i32
    %c0_i32_1 = arith.constant 0 : i32
    return %c0_i32, %c0_i32_0 : i32, i32
  }
  func.func @transform_3(%arg0: i32) -> (i32, i32) {
    %c0_i32 = arith.constant 0 : i32
    %c0_i32_0 = arith.constant 0 : i32
    %c0_i32_1 = arith.constant 0 : i32
    return %c0_i32, %c0_i32_0 : i32, i32
  }
  func.func @transform_4(%arg0: i32) -> (i32, i32) {
    %c0_i32 = arith.constant 0 : i32
    %c0_i32_0 = arith.constant 0 : i32
    %c0_i32_1 = arith.constant 0 : i32
    return %c0_i32, %c0_i32_0 : i32, i32
  }
  func.func @transform_5(%arg0: i32) -> (i32, i32) {
    %c0_i32 = arith.constant 0 : i32
    %c0_i32_0 = arith.constant 0 : i32
    %c0_i32_1 = arith.constant 0 : i32
    return %c0_i32, %c0_i32_0 : i32, i32
  }
  func.func @transform_6(%arg0: i32) -> (i32, i32) {
    %c0_i32 = arith.constant 0 : i32
    %c0_i32_0 = arith.constant 0 : i32
    %c0_i32_1 = arith.constant 0 : i32
    return %c0_i32, %c0_i32_0 : i32, i32
  }
  func.func @transform_7(%arg0: i32) -> (i32, i32) {
    %c0_i32 = arith.constant 0 : i32
    %c0_i32_0 = arith.constant 0 : i32
    return %arg0, %c0_i32 : i32, i32
  }
}

module attributes {stable_mosaic.version = 11 : i64} {
  func.func @dc_mlp_kernel(%arg0: i32, %arg1: memref<128x1xf32, #tpu.memory_space<vmem>>, %arg2: memref<1x128xf32, #tpu.memory_space<vmem>>, %arg3: memref<1x128xf32, #tpu.memory_space<vmem>>, %arg4: memref<128x128xf32, #tpu.memory_space<vmem>>, %arg5: memref<1x128xf32, #tpu.memory_space<vmem>>, %arg6: memref<128x8xf32, #tpu.memory_space<vmem>>, %arg7: memref<1x128xf32, #tpu.memory_space<vmem>>, %arg8: memref<128x8xf32, #tpu.memory_space<vmem>>) attributes {dimension_semantics = [#tpu.dimension_semantics<parallel>], iteration_bounds = array<i64: 1>, scalar_prefetch = 0 : i64, scratch_operands = 0 : i64, tpu.core_type = #tpu.core_type<tc>, window_params = [{transform_indices = @transform_0, window_bounds = array<i64: 128, 1>}, {pipeline_mode = #tpu.pipeline_mode<synchronous>, transform_indices = @transform_1, window_bounds = array<i64: 1, 128>}, {pipeline_mode = #tpu.pipeline_mode<synchronous>, transform_indices = @transform_2, window_bounds = array<i64: 1, 128>}, {pipeline_mode = #tpu.pipeline_mode<synchronous>, transform_indices = @transform_3, window_bounds = array<i64: 128, 128>}, {pipeline_mode = #tpu.pipeline_mode<synchronous>, transform_indices = @transform_4, window_bounds = array<i64: 1, 128>}, {pipeline_mode = #tpu.pipeline_mode<synchronous>, transform_indices = @transform_5, window_bounds = array<i64: 128, 8>}, {pipeline_mode = #tpu.pipeline_mode<synchronous>, transform_indices = @transform_6, window_bounds = array<i64: 1, 128>}, {transform_indices = @transform_7, window_bounds = array<i64: 128, 8>}]} {
    %c0 = arith.constant 0 : index
    %c0_0 = arith.constant 0 : index
    %0 = vector.load %arg1[%c0, %c0_0] : memref<128x1xf32, #tpu.memory_space<vmem>>, vector<128x1xf32>
    %c0_1 = arith.constant 0 : index
    %c0_2 = arith.constant 0 : index
    %1 = vector.load %arg2[%c0_1, %c0_2] : memref<1x128xf32, #tpu.memory_space<vmem>>, vector<1x128xf32>
    %2 = vector.broadcast %0 : vector<128x1xf32> to vector<128x128xf32>
    %3 = vector.broadcast %1 : vector<1x128xf32> to vector<128x128xf32>
    %4 = arith.mulf %2, %3 : vector<128x128xf32>
    %c0_3 = arith.constant 0 : index
    %c0_4 = arith.constant 0 : index
    %5 = vector.load %arg3[%c0_3, %c0_4] : memref<1x128xf32, #tpu.memory_space<vmem>>, vector<1x128xf32>
    %6 = vector.broadcast %5 : vector<1x128xf32> to vector<128x128xf32>
    %7 = arith.addf %4, %6 : vector<128x128xf32>
    %cst = arith.constant 0.000000e+00 : f32
    %8 = vector.broadcast %cst : f32 to vector<128x128xf32>
    %9 = arith.maximumf %7, %8 : vector<128x128xf32>
    %c0_5 = arith.constant 0 : index
    %c0_6 = arith.constant 0 : index
    %10 = vector.load %arg4[%c0_5, %c0_6] : memref<128x128xf32, #tpu.memory_space<vmem>>, vector<128x128xf32>
    %cst_7 = arith.constant dense<0.000000e+00> : vector<128x128xf32>
    %11 = tpu.matmul %9, %10, %cst_7 {dimension_numbers = #tpu.dot_dimension_numbers<[1], [0], [0], [1], [0, 0, 1, 1], [], []>} : vector<128x128xf32>, vector<128x128xf32>, vector<128x128xf32> -> vector<128x128xf32>
    %c0_8 = arith.constant 0 : index
    %c0_9 = arith.constant 0 : index
    %12 = vector.load %arg5[%c0_8, %c0_9] : memref<1x128xf32, #tpu.memory_space<vmem>>, vector<1x128xf32>
    %13 = vector.broadcast %12 : vector<1x128xf32> to vector<128x128xf32>
    %14 = arith.addf %11, %13 : vector<128x128xf32>
    %cst_10 = arith.constant 0.000000e+00 : f32
    %15 = vector.broadcast %cst_10 : f32 to vector<128x128xf32>
    %16 = arith.maximumf %14, %15 : vector<128x128xf32>
    %c0_11 = arith.constant 0 : index
    %c0_12 = arith.constant 0 : index
    %17 = vector.load %arg6[%c0_11, %c0_12] : memref<128x8xf32, #tpu.memory_space<vmem>>, vector<128x8xf32>
    %cst_13 = arith.constant dense<0.000000e+00> : vector<128x8xf32>
    %18 = tpu.matmul %16, %17, %cst_13 {dimension_numbers = #tpu.dot_dimension_numbers<[1], [0], [0], [1], [0, 0, 1, 1], [], []>} : vector<128x128xf32>, vector<128x8xf32>, vector<128x8xf32> -> vector<128x8xf32>
    %c0_14 = arith.constant 0 : index
    %c0_15 = arith.constant 0 : index
    %19 = vector.load %arg7[%c0_14, %c0_15] : memref<1x128xf32, #tpu.memory_space<vmem>>, vector<1x128xf32>
    %20 = vector.extract_strided_slice %19 {offsets = [0, 0], sizes = [1, 8], strides = [1, 1]} : vector<1x128xf32> to vector<1x8xf32>
    %21 = vector.broadcast %20 : vector<1x8xf32> to vector<128x8xf32>
    %22 = arith.addf %18, %21 : vector<128x8xf32>
    %23 = arith.negf %22 : vector<128x8xf32>
    %24 = math.exp %23 : vector<128x8xf32>
    %cst_16 = arith.constant 1.000000e+00 : f32
    %25 = vector.broadcast %cst_16 : f32 to vector<128x8xf32>
    %26 = arith.addf %25, %24 : vector<128x8xf32>
    %27 = arith.divf %25, %26 : vector<128x8xf32>
    %c0_17 = arith.constant 0 : index
    %c0_18 = arith.constant 0 : index
    %28 = vector.load %arg8[%c0_17, %c0_18] : memref<128x8xf32, #tpu.memory_space<vmem>>, vector<128x8xf32>
    tpu.vector_store %arg8[%c0_17, %c0_18], %27 {strides = array<i32>} : memref<128x8xf32, #tpu.memory_space<vmem>>, vector<128x8xf32>,
    return
  }
  func.func @transform_0(%arg0: i32) -> (i32, i32) {
    %c0_i32 = arith.constant 0 : i32
    %c0_i32_0 = arith.constant 0 : i32
    return %arg0, %c0_i32 : i32, i32
  }
  func.func @transform_1(%arg0: i32) -> (i32, i32) {
    %c0_i32 = arith.constant 0 : i32
    %c0_i32_0 = arith.constant 0 : i32
    %c0_i32_1 = arith.constant 0 : i32
    return %c0_i32, %c0_i32_0 : i32, i32
  }
  func.func @transform_2(%arg0: i32) -> (i32, i32) {
    %c0_i32 = arith.constant 0 : i32
    %c0_i32_0 = arith.constant 0 : i32
    %c0_i32_1 = arith.constant 0 : i32
    return %c0_i32, %c0_i32_0 : i32, i32
  }
  func.func @transform_3(%arg0: i32) -> (i32, i32) {
    %c0_i32 = arith.constant 0 : i32
    %c0_i32_0 = arith.constant 0 : i32
    %c0_i32_1 = arith.constant 0 : i32
    return %c0_i32, %c0_i32_0 : i32, i32
  }
  func.func @transform_4(%arg0: i32) -> (i32, i32) {
    %c0_i32 = arith.constant 0 : i32
    %c0_i32_0 = arith.constant 0 : i32
    %c0_i32_1 = arith.constant 0 : i32
    return %c0_i32, %c0_i32_0 : i32, i32
  }
  func.func @transform_5(%arg0: i32) -> (i32, i32) {
    %c0_i32 = arith.constant 0 : i32
    %c0_i32_0 = arith.constant 0 : i32
    %c0_i32_1 = arith.constant 0 : i32
    return %c0_i32, %c0_i32_0 : i32, i32
  }
  func.func @transform_6(%arg0: i32) -> (i32, i32) {
    %c0_i32 = arith.constant 0 : i32
    %c0_i32_0 = arith.constant 0 : i32
    %c0_i32_1 = arith.constant 0 : i32
    return %c0_i32, %c0_i32_0 : i32, i32
  }
  func.func @transform_7(%arg0: i32) -> (i32, i32) {
    %c0_i32 = arith.constant 0 : i32
    %c0_i32_0 = arith.constant 0 : i32
    return %arg0, %c0_i32 : i32, i32
  }
}

</mosaic_0001>

<bundles_post_ra>
// kernel: dc_model_forward.1
= control target key start
LH: loop header
LB: loop body
LE: loop exit
PB: predicated region body
PF: predicated region fallthrough
CT: control target
= control target key end

     0   :  { %v809_v0 = vmov 0   ;;  %vm668_vm3 = vcmask 64512   ;;  %s1246_s0 = inlined_call_operand.vmem [shape: f32[128,1], index: 0, kind: input, shape index: {}]   ;;  %s1247_s1 = inlined_call_operand.vmem [shape: f32[1,128], index: 1, kind: input, shape index: {}]   ;;  %s1248_s2 = inlined_call_operand.vmem [shape: f32[1,128], index: 2, kind: input, shape index: {}]   ;;  %s1249_s3 = inlined_call_operand.vmem [shape: f32[128,128], index: 3, kind: input, shape index: {}]   ;;  %s1250_s4 = inlined_call_operand.vmem [shape: f32[1,128], index: 4, kind: input, shape index: {}]   ;;  %s1251_s5 = inlined_call_operand.vmem [shape: f32[128,8], index: 5, kind: input, shape index: {}]   ;;  %s1252_s6 = inlined_call_operand.vmem [shape: f32[1,128], index: 6, kind: input, shape index: {}]   ;;  %s1253_s7 = inlined_call_operand.vmem [shape: f32[128,8], index: 7, kind: output, shape index: {}]  }
   0x1   :  { %739 = vset.pattern.permute.xlu1 %v809_v0  ;;  %738 = vset.pattern.permute.xlu0 %v809_v0  ;;  %v34_v1 = vld [vmem:[%s1246_s0 + $0x40] sm:$0xff]  ;;  %v27_v3 = vld [vmem:[%s1246_s0 + $0x8] sm:$0xff]  ;;  %v36_v5 = vld [vmem:[%s1246_s0 + $0x50] sm:$0xff] }
   0x2   :  { %v26_v2 = vld [vmem:[%s1246_s0] sm:$0xff]  ;;  %85 = vperm.xlu0 %738, %v34_v1   ;;  %740 = vset.pattern.permute.xlu2 %v809_v0  ;;  %v35_v4 = vld [vmem:[%s1246_s0 + $0x48] sm:$0xff]  ;;  %v37_v6 = vld [vmem:[%s1246_s0 + $0x58] sm:$0xff] }
   0x3   :  { %45 = vperm.xlu1 %739, %v26_v2   ;;  %50 = vperm.xlu2 %740, %v27_v3   ;;  %v193_v7 = vld [vmem:[%s1249_s3 + $0x78] sm:$0xff]  ;;  %v192_v8 = vld [vmem:[%s1249_s3 + $0x70] sm:$0xff]  ;;  %v191_v9 = vld [vmem:[%s1249_s3 + $0x68] sm:$0xff] }
   0x4   :  { %198 = vmatpush.msra.mxu0 %v193_v7  ;;  %705 = vmatpush.msra.mxu2 %v193_v7  ;;  %v190_v10 = vld [vmem:[%s1249_s3 + $0x60] sm:$0xff]  ;;  %v28_v11 = vld [vmem:[%s1246_s0 + $0x10] sm:$0xff]  ;;  %v189_v13 = vld [vmem:[%s1249_s3 + $0x58] sm:$0xff] }
   0x5   :  { %v38_v12 = vld [vmem:[%s1246_s0 + $0x60] sm:$0xff]  ;;  %v29_v14 = vld [vmem:[%s1246_s0 + $0x18] sm:$0xff]  ;;  %v39_v15 = vld [vmem:[%s1246_s0 + $0x68] sm:$0xff] }
   0x6   :  { %199 = vmatpush.msra.mxu0 %v192_v8  ;;  %706 = vmatpush.msra.mxu2 %v192_v8  ;;  %v30_v16 = vld [vmem:[%s1246_s0 + $0x20] sm:$0xff]  ;;  %v40_v17 = vld [vmem:[%s1246_s0 + $0x70] sm:$0xff]  ;;  %v31_v18 = vld [vmem:[%s1246_s0 + $0x28] sm:$0xff] }
   0x7   :  { %v41_v19 = vld [vmem:[%s1246_s0 + $0x78] sm:$0xff]  ;;  %v32_v20 = vld [vmem:[%s1246_s0 + $0x30] sm:$0xff]  ;;  %v187_v23 = vld [vmem:[%s1249_s3 + $0x48] sm:$0xff] }
   0x8   :  { %200 = vmatpush.msra.mxu0 %v191_v9  ;;  %707 = vmatpush.msra.mxu2 %v191_v9  ;;  %v33_v21 = vld [vmem:[%s1246_s0 + $0x38] sm:$0xff]  ;;  %v188_v22 = vld [vmem:[%s1249_s3 + $0x50] sm:$0xff]  ;;  %v186_v24 = vld [vmem:[%s1249_s3 + $0x40] sm:$0xff] }
   0x9   :  { %v185_v25 = vld [vmem:[%s1249_s3 + $0x38] sm:$0xff]  ;;  %v184_v26 = vld [vmem:[%s1249_s3 + $0x30] sm:$0xff]  ;;  %v183_v27 = vld [vmem:[%s1249_s3 + $0x28] sm:$0xff] }
   0xa   :  { %90 = vperm.xlu0 %738, %v35_v4   ;;  %201 = vmatpush.msra.mxu0 %v190_v10  ;;  %v182_v28 = vld [vmem:[%s1249_s3 + $0x20] sm:$0xff]  ;;  %v181_v29 = vld [vmem:[%s1249_s3 + $0x18] sm:$0xff]  ;;  %v180_v30 = vld [vmem:[%s1249_s3 + $0x10] sm:$0xff] }
   0xb   :  { %95 = vperm.xlu1 %739, %v36_v5   ;;  %100 = vperm.xlu2 %740, %v37_v6   ;;  %v179_v31 = vld [vmem:[%s1249_s3 + $0x8] sm:$0xff]  ;;  %v178_v32 = vld [vmem:[%s1249_s3] sm:$0xff]  ;;  %v294_v8 = vld [vmem:[%s1251_s5 + $0x78] sm:$0xff] }
   0xc   :  { %708 = vmatpush.msra.mxu2 %v190_v10  ;;  %202 = vmatpush.msra.mxu0 %v189_v13  ;;  %v949_v33 = vld [vmem:[%s1247_s1] ss:$0 sm:$0xff]  ;;  %v293_v9 = vld [vmem:[%s1251_s5 + $0x70] sm:$0xff] }
   0xd   :  { %v954_v35 = vld [vmem:[%s1248_s2] ss:$0 sm:$0xff]  ;;  %299 = vmatpush.msra.mxu1 %v294_v8  ;;  %721 = vmatpush.msra.mxu3 %v294_v8 }
   0xe   :  { %709 = vmatpush.msra.mxu2 %v189_v13  ;;  %203 = vmatpush.msra.mxu0 %v188_v22  ;;  %v292_v13 = vld [vmem:[%s1251_s5 + $0x68] sm:$0xff] }
   0xf   :  { %300 = vmatpush.msra.mxu1 %v293_v9  ;;  %722 = vmatpush.msra.mxu3 %v293_v9 }
  0x10   :  { %710 = vmatpush.msra.mxu2 %v188_v22  ;;  %204 = vmatpush.msra.mxu0 %v187_v23 }
  0x11   :  { %301 = vmatpush.msra.mxu1 %v292_v13  ;;  %723 = vmatpush.msra.mxu3 %v292_v13 }
  0x12   :  { %55 = vperm.xlu0 %738, %v28_v11   ;;  %711 = vmatpush.msra.mxu2 %v187_v23 }
  0x13   :  { %105 = vperm.xlu1 %739, %v38_v12   ;;  %60 = vperm.xlu2 %740, %v29_v14  }
  0x14   :  { %205 = vmatpush.msra.mxu0 %v186_v24  ;;  %712 = vmatpush.msra.mxu2 %v186_v24  ;;  %v288_v24 = vld [vmem:[%s1251_s5 + $0x48] sm:$0xff] }
  0x16   :  { %206 = vmatpush.msra.mxu0 %v185_v25  ;;  %713 = vmatpush.msra.mxu2 %v185_v25 }
  0x18   :  { %207 = vmatpush.msra.mxu0 %v184_v26  ;;  %714 = vmatpush.msra.mxu2 %v184_v26  ;;  %v287_v26 = vld [vmem:[%s1251_s5 + $0x40] sm:$0xff] }
  0x1a   :  { %110 = vperm.xlu0 %738, %v39_v15   ;;  %208 = vmatpush.msra.mxu0 %v183_v27  ;;  %v291_v15 = vld [vmem:[%s1251_s5 + $0x60] sm:$0xff] }
  0x1b   :  { %65 = vperm.xlu1 %739, %v30_v16   ;;  %115 = vperm.xlu2 %740, %v40_v17  }
  0x1c   :  { %715 = vmatpush.msra.mxu2 %v183_v27  ;;  %209 = vmatpush.msra.mxu0 %v182_v28 }
  0x1d   :  { %302 = vmatpush.msra.mxu1 %v291_v15  ;;  %724 = vmatpush.msra.mxu3 %v291_v15 }
  0x1e   :  { %716 = vmatpush.msra.mxu2 %v182_v28  ;;  %210 = vmatpush.msra.mxu0 %v181_v29 }
  0x20   :  { %717 = vmatpush.msra.mxu2 %v181_v29  ;;  %211 = vmatpush.msra.mxu0 %v180_v30 }
  0x22   :  { %70 = vperm.xlu0 %738, %v31_v18   ;;  %718 = vmatpush.msra.mxu2 %v180_v30 }
  0x23   :  { %120 = vperm.xlu1 %739, %v41_v19   ;;  %75 = vperm.xlu2 %740, %v32_v20   ;;  %v290_v20 = vld [vmem:[%s1251_s5 + $0x58] sm:$0xff] }
  0x24   :  { %212 = vmatpush.msra.mxu0 %v179_v31  ;;  %719 = vmatpush.msra.mxu2 %v179_v31  ;;  %v286_v31 = vld [vmem:[%s1251_s5 + $0x38] sm:$0xff] }
  0x25   :  { %303 = vmatpush.msra.mxu1 %v290_v20  ;;  %725 = vmatpush.msra.mxu3 %v290_v20 }
  0x26   :  { %213 = vmatpush.msra.mxu0 %v178_v32  ;;  %720 = vmatpush.msra.mxu2 %v178_v32  ;;  %v285_v32 = vld [vmem:[%s1251_s5 + $0x30] sm:$0xff] }
  0x2a   :  { %80 = vperm.xlu0 %738, %v33_v21   ;;  %v289_v21 = vld [vmem:[%s1251_s5 + $0x50] sm:$0xff] }
  0x2b   :  { %304 = vmatpush.msra.mxu1 %v289_v21  ;;  %726 = vmatpush.msra.mxu3 %v289_v21 }
  0x2d   :  { %305 = vmatpush.msra.mxu1 %v288_v24  ;;  %727 = vmatpush.msra.mxu3 %v288_v24 }
  0x2f   :  { %306 = vmatpush.msra.mxu1 %v287_v26  ;;  %728 = vmatpush.msra.mxu3 %v287_v26 }
  0x31   :  { %307 = vmatpush.msra.mxu1 %v286_v31  ;;  %729 = vmatpush.msra.mxu3 %v286_v31 }
  0x33   :  { %308 = vmatpush.msra.mxu1 %v285_v32  ;;  %730 = vmatpush.msra.mxu3 %v285_v32 }
  0x5d   :  { %v51_v34 = vpop.permute.xlu2 %50 }
  0x5e   :  { %v127_v40 = vmul.f32 %v949_v33, %v51_v34 }
  0x60   :  { %v147_v45 = vadd.f32 %v954_v35, %v127_v40  ;;  %v283_v40 = vld [vmem:[%s1251_s5 + $0x20] sm:$0xff] }
  0x62   :  { %v163_v50 = vmax.f32 %v147_v45, 0.0  ;;  %v282_v45 = vld [vmem:[%s1251_s5 + $0x18] sm:$0xff] }
  0x65   :  { %v101_v49 = vpop.permute.xlu2 %100 }
  0x66   :  { %v137_v60 = vmul.f32 %v949_v33, %v101_v49 }
  0x68   :  { %v157_v2 = vadd.f32 %v954_v35, %v137_v60 }
  0x6a   :  { %v173_v7 = vmax.f32 %v157_v2, 0.0 }
  0x6d   :  { %v61_v59 = vpop.permute.xlu2 %60 }
  0x6e   :  { %v129_v61 = vmul.f32 %v949_v33, %v61_v59 }
  0x70   :  { %v149_v1 = vadd.f32 %v954_v35, %v129_v61 }
  0x72   :  { %v165_v6 = vmax.f32 %v149_v1, 0.0 }
  0x74   :  { %v86_v36 = vpop.permute.xlu0 %85 }
  0x75   :  { %v46_v37 = vpop.permute.xlu1 %45  ;;  %v134_v38 = vmul.f32 %v949_v33, %v86_v36  ;;  %v116_v10 = vpop.permute.xlu2 %115 }
  0x76   :  { %v126_v39 = vmul.f32 %v949_v33, %v46_v37  ;;  %v140_v27 = vmul.f32 %v949_v33, %v116_v10  ;;  %v284_v37 = vld [vmem:[%s1251_s5 + $0x28] sm:$0xff] }
  0x77   :  { %v154_v42 = vadd.f32 %v954_v35, %v134_v38  ;;  %309 = vmatpush.msra.mxu1 %v284_v37  ;;  %731 = vmatpush.msra.mxu3 %v284_v37 }
  0x78   :  { %v146_v41 = vadd.f32 %v954_v35, %v126_v39  ;;  %v160_v36 = vadd.f32 %v954_v35, %v140_v27 }
  0x79   :  { %v170_v44 = vmax.f32 %v154_v42, 0.0  ;;  %310 = vmatpush.msra.mxu1 %v283_v40  ;;  %732 = vmatpush.msra.mxu3 %v283_v40 }
  0x7a   :  { %v162_v43 = vmax.f32 %v146_v41, 0.0 }
  0x7b   :  { %238 = vmatmul.f32.vlgmr.msra.gmra.mxu2 %v170_v44  ;;  %v176_v44 = vmax.f32 %v160_v36, 0.0  ;;  %311 = vmatpush.msra.mxu1 %v282_v45 }
  0x7c   :  { %214 = vmatmul.f32.vlgmr.msra.gmra.mxu0 %v162_v43  ;;  %v91_v46 = vpop.permute.xlu0 %90  ;;  %733 = vmatpush.msra.mxu3 %v282_v45 }
  0x7d   :  { %v96_v47 = vpop.permute.xlu1 %95  ;;  %v135_v48 = vmul.f32 %v949_v33, %v91_v46  ;;  %v76_v25 = vpop.permute.xlu2 %75 }
  0x7e   :  { %v136_v52 = vmul.f32 %v949_v33, %v96_v47  ;;  %v132_v28 = vmul.f32 %v949_v33, %v76_v25 }
  0x7f   :  { %v155_v51 = vadd.f32 %v954_v35, %v135_v48 }
  0x80   :  { %v156_v57 = vadd.f32 %v954_v35, %v136_v52  ;;  %v152_v34 = vadd.f32 %v954_v35, %v132_v28 }
  0x81   :  { %v171_v53 = vmax.f32 %v155_v51, 0.0  ;;  %v743_v51 = vld [vmem:[%s1250_s4] ss:$0 sm:$0xff] }
  0x82   :  { %v172_v63 = vmax.f32 %v156_v57, 0.0  ;;  %v168_v43 = vmax.f32 %v152_v34, 0.0 }
  0x83   :  { %241 = vmatmul.f32.gmra.mxu2 %v171_v53 }
  0x84   :  { %217 = vmatmul.f32.gmra.mxu0 %v163_v50  ;;  %v56_v54 = vpop.permute.xlu0 %55  ;;  %v280_v50 = vld [vmem:[%s1251_s5 + $0x8] sm:$0xff] }
  0x85   :  { %v106_v55 = vpop.permute.xlu1 %105  ;;  %v128_v56 = vmul.f32 %v949_v33, %v56_v54 }
  0x86   :  { %v138_v4 = vmul.f32 %v949_v33, %v106_v55 }
  0x87   :  { %v148_v58 = vadd.f32 %v954_v35, %v128_v56 }
  0x88   :  { %v158_v12 = vadd.f32 %v954_v35, %v138_v4 }
  0x89   :  { %v164_v62 = vmax.f32 %v148_v58, 0.0 }
  0x8a   :  { %v174_v19 = vmax.f32 %v158_v12, 0.0 }
  0x8b   :  { %244 = vmatmul.f32.gmra.mxu2 %v172_v63 }
  0x8c   :  { %220 = vmatmul.f32.gmra.mxu0 %v164_v62  ;;  %v111_v0 = vpop.permute.xlu0 %110 }
  0x8d   :  { %v66_v3 = vpop.permute.xlu1 %65  ;;  %v139_v16 = vmul.f32 %v949_v33, %v111_v0 }
  0x8e   :  { %v130_v5 = vmul.f32 %v949_v33, %v66_v3 }
  0x8f   :  { %v159_v23 = vadd.f32 %v954_v35, %v139_v16 }
  0x90   :  { %v150_v11 = vadd.f32 %v954_v35, %v130_v5 }
  0x91   :  { %v175_v30 = vmax.f32 %v159_v23, 0.0 }
  0x92   :  { %v166_v18 = vmax.f32 %v150_v11, 0.0 }
  0x93   :  { %247 = vmatmul.f32.gmra.mxu2 %v173_v7 }
  0x94   :  { %223 = vmatmul.f32.gmra.mxu0 %v165_v6  ;;  %v71_v14 = vpop.permute.xlu0 %70 }
  0x95   :  { %v131_v17 = vmul.f32 %v949_v33, %v71_v14  ;;  %v121_v38 = vpop.permute.xlu1 %120 }
  0x96   :  { %v141_v41 = vmul.f32 %v949_v33, %v121_v38  ;;  %v1042_v38 = vld [vmem:[%s1252_s6] ss:$0 sm:$0xff] }
  0x97   :  { %v151_v22 = vadd.f32 %v954_v35, %v131_v17 }
  0x98   :  { %v161_v47 = vadd.f32 %v954_v35, %v141_v41 }
  0x99   :  { %v167_v29 = vmax.f32 %v151_v22, 0.0 }
  0x9a   :  { %v177_v49 = vmax.f32 %v161_v47, 0.0 }
  0x9b   :  { %250 = vmatmul.f32.gmra.mxu2 %v174_v19 }
  0x9c   :  { %226 = vmatmul.f32.gmra.mxu0 %v166_v18  ;;  %v81_v39 = vpop.permute.xlu0 %80 }
  0x9d   :  { %v133_v42 = vmul.f32 %v949_v33, %v81_v39  ;;  %v281_v33 = vld [vmem:[%s1251_s5 + $0x10] sm:$0xff] }
  0x9e   :  { %312 = vmatpush.msra.mxu1 %v281_v33  ;;  %734 = vmatpush.msra.mxu3 %v281_v33 }
  0x9f   :  { %v153_v46 = vadd.f32 %v954_v35, %v133_v42  ;;  %v279_v35 = vld [vmem:[%s1251_s5] sm:$0xff] }
  0xa0   :  { %313 = vmatpush.msra.mxu1 %v280_v50  ;;  %735 = vmatpush.msra.mxu3 %v280_v50 }
  0xa1   :  { %v169_v48 = vmax.f32 %v153_v46, 0.0 }
  0xa2   :  { %314 = vmatpush.msra.mxu1 %v279_v35  ;;  %736 = vmatpush.msra.mxu3 %v279_v35 }
  0xa3   :  { %253 = vmatmul.f32.gmra.mxu2 %v175_v30 }
  0xa4   :  { %229 = vmatmul.f32.gmra.mxu0 %v167_v29 }
  0xab   :  { %256 = vmatmul.f32.gmra.mxu2 %v176_v44 }
  0xac   :  { %232 = vmatmul.f32.gmra.mxu0 %v168_v43 }
  0xb3   :  { %259 = vmatmul.f32.gmra.mxu2 %v177_v49 }
  0xb4   :  { %235 = vmatmul.f32.gmra.mxu0 %v169_v48 }
  0xf9   :  { %v215_v52 = vpop.f32.mrf.mxu0 }
  0xfa   :  { %v216_v53 = vadd.f32 %v743_v51, %v215_v52 }
  0xfc   :  { %v263_v54 = vmax.f32 %v216_v53, 0.0 }
  0xfe   :  { %315 = vmatmul.f32.vlgmr.msra.gmra.mxu1 %v263_v54  ;;  %v239_v55 = vpop.f32.mrf.mxu2 }
  0xff   :  { %v240_v56 = vadd.f32 %v743_v51, %v239_v55 }
 0x101   :  { %v218_v57 = vpop.f32.mrf.mxu0  ;;  %v271_v58 = vmax.f32 %v240_v56, 0.0 }
 0x102   :  { %v219_v59 = vadd.f32 %v743_v51, %v218_v57 }
 0x103   :  { %339 = vmatmul.f32.vlgmr.msra.gmra.mxu3 %v271_v58 }
 0x104   :  { %v264_v60 = vmax.f32 %v219_v59, 0.0 }
 0x106   :  { %318 = vmatmul.f32.gmra.mxu1 %v264_v60  ;;  %v242_v61 = vpop.f32.mrf.mxu2 }
 0x107   :  { %v243_v62 = vadd.f32 %v743_v51, %v242_v61 }
 0x109   :  { %v221_v63 = vpop.f32.mrf.mxu0  ;;  %v272_v0 = vmax.f32 %v243_v62, 0.0 }
 0x10a   :  { %v222_v1 = vadd.f32 %v743_v51, %v221_v63 }
 0x10b   :  { %342 = vmatmul.f32.gmra.mxu3 %v272_v0 }
 0x10c   :  { %v265_v2 = vmax.f32 %v222_v1, 0.0 }
 0x10e   :  { %321 = vmatmul.f32.gmra.mxu1 %v265_v2  ;;  %v245_v3 = vpop.f32.mrf.mxu2 }
 0x10f   :  { %v246_v4 = vadd.f32 %v743_v51, %v245_v3 }
 0x111   :  { %v224_v5 = vpop.f32.mrf.mxu0  ;;  %v273_v6 = vmax.f32 %v246_v4, 0.0 }
 0x112   :  { %v225_v7 = vadd.f32 %v743_v51, %v224_v5 }
 0x113   :  { %345 = vmatmul.f32.gmra.mxu3 %v273_v6 }
 0x114   :  { %v266_v8 = vmax.f32 %v225_v7, 0.0 }
 0x116   :  { %324 = vmatmul.f32.gmra.mxu1 %v266_v8  ;;  %v248_v9 = vpop.f32.mrf.mxu2 }
 0x117   :  { %v249_v10 = vadd.f32 %v743_v51, %v248_v9 }
 0x119   :  { %v227_v11 = vpop.f32.mrf.mxu0  ;;  %v274_v12 = vmax.f32 %v249_v10, 0.0 }
 0x11a   :  { %v228_v13 = vadd.f32 %v743_v51, %v227_v11 }
 0x11b   :  { %348 = vmatmul.f32.gmra.mxu3 %v274_v12 }
 0x11c   :  { %v267_v14 = vmax.f32 %v228_v13, 0.0 }
 0x11e   :  { %327 = vmatmul.f32.gmra.mxu1 %v267_v14  ;;  %v251_v15 = vpop.f32.mrf.mxu2 }
 0x11f   :  { %v252_v16 = vadd.f32 %v743_v51, %v251_v15 }
 0x121   :  { %v230_v17 = vpop.f32.mrf.mxu0  ;;  %v275_v18 = vmax.f32 %v252_v16, 0.0 }
 0x122   :  { %v231_v19 = vadd.f32 %v743_v51, %v230_v17 }
 0x123   :  { %351 = vmatmul.f32.gmra.mxu3 %v275_v18 }
 0x124   :  { %v268_v20 = vmax.f32 %v231_v19, 0.0 }
 0x126   :  { %330 = vmatmul.f32.gmra.mxu1 %v268_v20  ;;  %v254_v21 = vpop.f32.mrf.mxu2 }
 0x127   :  { %v255_v22 = vadd.f32 %v743_v51, %v254_v21 }
 0x129   :  { %v233_v23 = vpop.f32.mrf.mxu0  ;;  %v276_v24 = vmax.f32 %v255_v22, 0.0 }
 0x12a   :  { %v234_v25 = vadd.f32 %v743_v51, %v233_v23 }
 0x12b   :  { %354 = vmatmul.f32.gmra.mxu3 %v276_v24 }
 0x12c   :  { %v269_v26 = vmax.f32 %v234_v25, 0.0 }
 0x12e   :  { %333 = vmatmul.f32.gmra.mxu1 %v269_v26  ;;  %v257_v27 = vpop.f32.mrf.mxu2 }
 0x12f   :  { %v258_v28 = vadd.f32 %v743_v51, %v257_v27 }
 0x131   :  { %v236_v29 = vpop.f32.mrf.mxu0  ;;  %v277_v30 = vmax.f32 %v258_v28, 0.0 }
 0x132   :  { %v237_v31 = vadd.f32 %v743_v51, %v236_v29 }
 0x133   :  { %357 = vmatmul.f32.gmra.mxu3 %v277_v30 }
 0x134   :  { %v270_v32 = vmax.f32 %v237_v31, 0.0 }
 0x136   :  { %336 = vmatmul.f32.gmra.mxu1 %v270_v32  ;;  %v260_v34 = vpop.f32.mrf.mxu2 }
 0x137   :  { %v261_v36 = vadd.f32 %v743_v51, %v260_v34 }
 0x139   :  { %v278_v37 = vmax.f32 %v261_v36, 0.0 }
 0x13b   :  { %360 = vmatmul.f32.gmra.mxu3 %v278_v37 }
 0x17b   :  { %v316_v39 = vpop.f32.mrf.mxu1 }
 0x17c   :  { %v317_v40 = vadd.f32 %v1042_v38, %v316_v39 }
 0x17e   :  { %v689_v41 = vmul.f32 -1.442695, %v317_v40 }
 0x180   :  { %745 = vpow2.f32 %v689_v41 }
 0x183   :  { %v319_v42 = vpop.f32.mrf.mxu1 }
 0x184   :  { %v320_v43 = vadd.f32 %v1042_v38, %v319_v42 }
 0x186   :  { %v746_v44 = vpop.eup %745  ;;  %v690_v45 = vmul.f32 -1.442695, %v320_v43  ;;  %v340_v47 = vpop.f32.mrf.mxu3 }
 0x187   :  { %v412_v46 = vadd.f32 1.0, %v746_v44  ;;  %v341_v48 = vadd.f32 %v1042_v38, %v340_v47 }
 0x188   :  { %747 = vpow2.f32 %v690_v45 }
 0x189   :  { %749 = vrcp.f32 %v412_v46  ;;  %v697_v49 = vmul.f32 -1.442695, %v341_v48  ;;  %vm433_vm0 = vweird.f32 %v412_v46  ;;  %v437_v60 = vand.u32 2147483647, %v412_v46 }
 0x18a   :  { %v439_v61 = vand.u32 2147483648, %v412_v46 }
 0x18b   :  { %v322_v33 = vpop.f32.mrf.mxu1  ;;  %751 = vpow2.f32 %v697_v49  ;;  %vm438_vm4 = vcmp.eq.f32.partialorder %v437_v60, 8.507059e+37 }
 0x18c   :  { %v323_v50 = vadd.f32 %v1042_v38, %v322_v33  ;;  %v440_v6 = vor.u32 1.1754944e-38, %v439_v61 }
 0x18e   :  { %v748_v35 = vpop.eup %747  ;;  %v691_v51 = vmul.f32 -1.442695, %v323_v50  ;;  %v343_v54 = vpop.f32.mrf.mxu3 }
 0x18f   :  { %v750_v52 = vpop.eup %749  ;;  %v413_v53 = vadd.f32 1.0, %v748_v35  ;;  %v344_v56 = vadd.f32 %v1042_v38, %v343_v54 }
 0x190   :  { %v429_v55 = vmul.f32 %v750_v52, %v412_v46  ;;  %753 = vpow2.f32 %v691_v51  ;;  %vm434_vm1 = vweird.f32 %v750_v52 }
 0x191   :  { %755 = vrcp.f32 %v413_v53  ;;  %v752_v57 = vpop.eup %751  ;;  %v698_v59 = vmul.f32 -1.442695, %v344_v56  ;;  %vm435_vm2 = vmor %vm433_vm0, %vm434_vm1  ;;  %v452_v14 = vand.u32 2147483647, %v413_v53  ;;  %v454_v17 = vand.u32 2147483648, %v413_v53 }
 0x192   :  { %v430_v58 = vsub.f32 1.0, %v429_v55  ;;  %v1049_v62 = vadd.f32 1.0, %v752_v57  ;;  %vm448_vm5 = vweird.f32 %v413_v53 }
 0x193   :  { %v325_v63 = vpop.f32.mrf.mxu1  ;;  %757 = vpow2.f32 %v698_v59  ;;  %vm453_vm7 = vcmp.eq.f32.partialorder %v452_v14, 8.507059e+37  ;;  %v455_v29 = vor.u32 1.1754944e-38, %v454_v17 }
 0x194   :  { %v431_v0 = vmul.f32 %v750_v52, %v430_v58  ;;  %v326_v1 = vadd.f32 %v1042_v38, %v325_v63  ;;  %759 = vrcp.f32 %v1049_v62  ;;  %v557_v22 = vand.u32 2147483647, %v1049_v62 }
 0x195   :  { %v559_v23 = vand.u32 2147483648, %v1049_v62  ;;  %vm553_vm9 = vweird.f32 %v1049_v62 }
 0x196   :  { %v754_v2 = vpop.eup %753  ;;  %v432_v3 = vadd.f32 %v750_v52, %v431_v0  ;;  %v692_v4 = vmul.f32 -1.442695, %v326_v1  ;;  %v346_v8 = vpop.f32.mrf.mxu3  ;;  %vm1073_vm11 = vcmp.eq.f32.partialorder %v557_v22, 8.507059e+37 }
 0x197   :  { %v756_v5 = vpop.eup %755  ;;  %v1054_v7 = vadd.f32 1.0, %v754_v2  ;;  %v347_v15 = vadd.f32 %v1042_v38, %v346_v8  ;;  %v560_v41 = vor.u32 1.1754944e-38, %v559_v23 }
 0x198   :  { %v436_v9 = vsel %vm435_vm2, %v750_v52, %v432_v3  ;;  %v444_v10 = vmul.f32 %v756_v5, %v413_v53  ;;  %761 = vpow2.f32 %v692_v4  ;;  %vm449_vm6 = vweird.f32 %v756_v5 }
 0x199   :  { %v441_v11 = vsel %vm438_vm4, %v440_v6, %v436_v9  ;;  %763 = vrcp.f32 %v1054_v7  ;;  %v758_v12 = vpop.eup %757  ;;  %v699_v27 = vmul.f32 -1.442695, %v347_v15  ;;  %vm450_vm8 = vmor %vm448_vm5, %vm449_vm6  ;;  %vm463_vm12 = vweird.f32 %v1054_v7 }
 0x19a   :  { %669 = vst.msk [vmem:[%s1253_s7] sm:$0xff] %vm668_vm3, %v441_v11  ;;  %v445_v13 = vsub.f32 1.0, %v444_v10  ;;  %v760_v16 = vpop.eup %759  ;;  %v1062_v18 = vadd.f32 1.0, %v758_v12  ;;  %v467_v45 = vand.u32 2147483647, %v1054_v7  ;;  %v469_v46 = vand.u32 2147483648, %v1054_v7 }
 0x19b   :  { %v328_v19 = vpop.f32.mrf.mxu1  ;;  %v549_v21 = vmul.f32 %v760_v16, %v1049_v62  ;;  %vm554_vm10 = vweird.f32 %v760_v16 }
 0x19c   :  { %v446_v20 = vmul.f32 %v756_v5, %v445_v13  ;;  %765 = vrcp.f32 %v1062_v18  ;;  %v329_v31 = vadd.f32 %v1042_v38, %v328_v19  ;;  %vm555_vm13 = vmor %vm553_vm9, %vm554_vm10  ;;  %v572_v52 = vand.u32 2147483647, %v1062_v18 }
 0x19d   :  { %v550_v26 = vsub.f32 1.0, %v549_v21  ;;  %v574_v56 = vand.u32 2147483648, %v1062_v18  ;;  %vm468_vm0 = vcmp.eq.f32.partialorder %v467_v45, 8.507059e+37  ;;  %v470_v59 = vor.u32 1.1754944e-38, %v469_v46 }
 0x19e   :  { %v762_v24 = vpop.eup %761  ;;  %v447_v25 = vadd.f32 %v756_v5, %v446_v20  ;;  %v349_v32 = vpop.f32.mrf.mxu3  ;;  %v693_v47 = vmul.f32 -1.442695, %v329_v31  ;;  %vm568_vm1 = vweird.f32 %v1062_v18  ;;  %vm573_vm4 = vcmp.eq.f32.partialorder %v572_v52, 8.507059e+37 }
 0x19f   :  { %v764_v28 = vpop.eup %763  ;;  %v1069_v30 = vadd.f32 1.0, %v762_v24  ;;  %v551_v36 = vmul.f32 %v760_v16, %v550_v26  ;;  %v350_v48 = vadd.f32 %v1042_v38, %v349_v32  ;;  %v575_v6 = vor.u32 1.1754944e-38, %v574_v56 }
 0x1a0   :  { %v451_v34 = vsel %vm450_vm8, %v756_v5, %v447_v25  ;;  %v459_v37 = vmul.f32 %v764_v28, %v1054_v7  ;;  %vm464_vm14 = vweird.f32 %v764_v28 }
 0x1a1   :  { %v456_v39 = vsel %vm453_vm7, %v455_v29, %v451_v34  ;;  %767 = vrcp.f32 %v1069_v30  ;;  %v552_v42 = vadd.f32 %v760_v16, %v551_v36  ;;  %v700_v53 = vmul.f32 -1.442695, %v350_v48  ;;  %vm465_vm15 = vmor %vm463_vm12, %vm464_vm14 }
 0x1a2   :  { %670 = vst.msk [vmem:[%s1253_s7 + $0x8] sm:$0xff] %vm668_vm3, %v456_v39  ;;  %v460_v43 = vsub.f32 1.0, %v459_v37  ;;  %769 = vpow2.f32 %v699_v27  ;;  %v766_v44 = vpop.eup %765  ;;  %v482_v9 = vand.u32 2147483647, %v1069_v30  ;;  %v484_v10 = vand.u32 2147483648, %v1069_v30 }
 0x1a3   :  { %v331_v49 = vpop.f32.mrf.mxu1  ;;  %v556_v33 = vsel %vm555_vm13, %v760_v16, %v552_v42  ;;  %v564_v35 = vmul.f32 %v766_v44, %v1062_v18  ;;  %771 = vpow2.f32 %v693_v47  ;;  %vm569_vm2 = vweird.f32 %v766_v44 }
 0x1a4   :  { %v461_v50 = vmul.f32 %v764_v28, %v460_v43  ;;  %v561_v51 = vsel %vm1073_vm11, %v560_v41, %v556_v33  ;;  %v332_v57 = vadd.f32 %v1042_v38, %v331_v49  ;;  %773 = vpow2.f32 %v700_v53  ;;  %vm570_vm5 = vmor %vm568_vm1, %vm569_vm2 }
 0x1a5   :  { %677 = vst.msk [vmem:[%s1253_s7 + $0x40] sm:$0xff] %vm668_vm3, %v561_v51  ;;  %v565_v55 = vsub.f32 1.0, %v564_v35  ;;  %vm478_vm7 = vweird.f32 %v1069_v30  ;;  %v485_v19 = vor.u32 1.1754944e-38, %v484_v10  ;;  %vm483_vm9 = vcmp.eq.f32.partialorder %v482_v9, 8.507059e+37 }
 0x1a6   :  { %v462_v54 = vadd.f32 %v764_v28, %v461_v50  ;;  %v352_v60 = vpop.f32.mrf.mxu3  ;;  %v694_v3 = vmul.f32 -1.442695, %v332_v57 }
 0x1a7   :  { %v768_v58 = vpop.eup %767  ;;  %v566_v63 = vmul.f32 %v766_v44, %v565_v55  ;;  %v353_v4 = vadd.f32 %v1042_v38, %v352_v60 }
 0x1a8   :  { %v770_v61 = vpop.eup %769  ;;  %v466_v62 = vsel %vm465_vm15, %v764_v28, %v462_v54  ;;  %v474_v0 = vmul.f32 %v768_v58, %v1069_v30  ;;  %vm479_vm6 = vweird.f32 %v768_v58 }
 0x1a9   :  { %v471_v1 = vsel %vm468_vm0, %v470_v59, %v466_v62  ;;  %v1102_v2 = vadd.f32 1.0, %v770_v61  ;;  %v567_v5 = vadd.f32 %v766_v44, %v566_v63  ;;  %v772_v8 = vpop.eup %771  ;;  %v701_v17 = vmul.f32 -1.442695, %v353_v4  ;;  %vm480_vm8 = vmor %vm478_vm7, %vm479_vm6 }
 0x1aa   :  { %671 = vst.msk [vmem:[%s1253_s7 + $0x10] sm:$0xff] %vm668_vm3, %v471_v1  ;;  %v475_v7 = vsub.f32 1.0, %v474_v0  ;;  %v1114_v14 = vadd.f32 1.0, %v772_v8  ;;  %v774_v15 = vpop.eup %773 }
 0x1ab   :  { %775 = vrcp.f32 %v1102_v2  ;;  %v334_v11 = vpop.f32.mrf.mxu1  ;;  %v571_v12 = vsel %vm570_vm5, %v766_v44, %v567_v5  ;;  %v1123_v20 = vadd.f32 1.0, %v774_v15  ;;  %v587_v26 = vand.u32 2147483647, %v1102_v2 }
 0x1ac   :  { %v476_v13 = vmul.f32 %v768_v58, %v475_v7  ;;  %777 = vpow2.f32 %v694_v3  ;;  %v576_v16 = vsel %vm573_vm4, %v575_v6, %v571_v12  ;;  %v335_v21 = vadd.f32 %v1042_v38, %v334_v11 }
 0x1ad   :  { %678 = vst.msk [vmem:[%s1253_s7 + $0x48] sm:$0xff] %vm668_vm3, %v576_v16  ;;  %779 = vrcp.f32 %v1114_v14  ;;  %v589_v29 = vand.u32 2147483648, %v1102_v2  ;;  %vm583_vm10 = vweird.f32 %v1102_v2  ;;  %v497_v39 = vand.u32 2147483647, %v1114_v14 }
 0x1ae   :  { %v477_v18 = vadd.f32 %v768_v58, %v476_v13  ;;  %781 = vpow2.f32 %v701_v17  ;;  %v355_v22 = vpop.f32.mrf.mxu3  ;;  %v695_v31 = vmul.f32 -1.442695, %v335_v21  ;;  %v499_v40 = vand.u32 2147483648, %v1114_v14 }
 0x1af   :  { %783 = vrcp.f32 %v1123_v20  ;;  %v356_v32 = vadd.f32 %v1042_v38, %v355_v22  ;;  %vm1140_vm11 = vcmp.eq.f32.partialorder %v587_v26, 8.507059e+37  ;;  %v590_v46 = vor.u32 1.1754944e-38, %v589_v29 }
 0x1b0   :  { %v481_v23 = vsel %vm480_vm8, %v768_v58, %v477_v18  ;;  %vm493_vm13 = vweird.f32 %v1114_v14  ;;  %vm1150_vm14 = vcmp.eq.f32.partialorder %v497_v39, 8.507059e+37  ;;  %v500_v52 = vor.u32 1.1754944e-38, %v499_v40 }
 0x1b1   :  { %v776_v24 = vpop.eup %775  ;;  %v486_v25 = vsel %vm483_vm9, %v485_v19, %v481_v23  ;;  %v702_v33 = vmul.f32 -1.442695, %v356_v32  ;;  %v602_v58 = vand.u32 2147483647, %v1123_v20  ;;  %v604_v59 = vand.u32 2147483648, %v1123_v20 }
 0x1b2   :  { %v778_v27 = vpop.eup %777  ;;  %672 = vst.msk [vmem:[%s1253_s7 + $0x18] sm:$0xff] %vm668_vm3, %v486_v25  ;;  %v579_v28 = vmul.f32 %v776_v24, %v1102_v2  ;;  %vm584_vm12 = vweird.f32 %v776_v24  ;;  %vm598_vm2 = vweird.f32 %v1123_v20 }
 0x1b3   :  { %v1134_v30 = vadd.f32 1.0, %v778_v27  ;;  %v337_v34 = vpop.f32.mrf.mxu1  ;;  %v780_v36 = vpop.eup %779  ;;  %vm585_vm15 = vmor %vm583_vm10, %vm584_vm12  ;;  %vm603_vm6 = vcmp.eq.f32.partialorder %v602_v58, 8.507059e+37  ;;  %v605_v11 = vor.u32 1.1754944e-38, %v604_v59 }
 0x1b4   :  { %v580_v37 = vsub.f32 1.0, %v579_v28  ;;  %v782_v41 = vpop.eup %781  ;;  %v489_v43 = vmul.f32 %v780_v36, %v1114_v14  ;;  %v338_v44 = vadd.f32 %v1042_v38, %v337_v34  ;;  %vm494_vm0 = vweird.f32 %v780_v36 }
 0x1b5   :  { %785 = vrcp.f32 %v1134_v30  ;;  %v1147_v47 = vadd.f32 1.0, %v782_v41  ;;  %v784_v48 = vpop.eup %783  ;;  %vm495_vm1 = vmor %vm493_vm13, %vm494_vm0  ;;  %v512_v4 = vand.u32 2147483647, %v1134_v30  ;;  %v514_v12 = vand.u32 2147483648, %v1134_v30 }
 0x1b6   :  { %v581_v45 = vmul.f32 %v776_v24, %v580_v37  ;;  %v490_v49 = vsub.f32 1.0, %v489_v43  ;;  %787 = vpow2.f32 %v695_v31  ;;  %v358_v50 = vpop.f32.mrf.mxu3  ;;  %v594_v53 = vmul.f32 %v784_v48, %v1123_v20 }
 0x1b7   :  { %789 = vrcp.f32 %v1147_v47  ;;  %v696_v55 = vmul.f32 -1.442695, %v338_v44  ;;  %v359_v63 = vadd.f32 %v1042_v38, %v358_v50  ;;  %vm599_vm4 = vweird.f32 %v784_v48 }
 0x1b8   :  { %v582_v35 = vadd.f32 %v776_v24, %v581_v45  ;;  %v491_v54 = vmul.f32 %v780_v36, %v490_v49  ;;  %v595_v57 = vsub.f32 1.0, %v594_v53  ;;  %791 = vpow2.f32 %v702_v33  ;;  %vm600_vm5 = vmor %vm598_vm2, %vm599_vm4 }
 0x1b9   :  { %793 = vpow2.f32 %v696_v55  ;;  %v703_v5 = vmul.f32 -1.442695, %v359_v63  ;;  %vm508_vm8 = vweird.f32 %v1134_v30  ;;  %vm513_vm9 = vcmp.eq.f32.partialorder %v512_v4, 8.507059e+37 }
 0x1ba   :  { %v586_v56 = vsel %vm585_vm15, %v776_v24, %v582_v35  ;;  %v492_v62 = vadd.f32 %v780_v36, %v491_v54  ;;  %v596_v0 = vmul.f32 %v784_v48, %v595_v57  ;;  %v515_v23 = vor.u32 1.1754944e-38, %v514_v12 }
 0x1bb   :  { %v786_v60 = vpop.eup %785  ;;  %v591_v61 = vsel %vm1140_vm11, %v590_v46, %v586_v56  ;;  %795 = vpow2.f32 %v703_v5  ;;  %v617_v24 = vand.u32 2147483647, %v1147_v47  ;;  %v619_v25 = vand.u32 2147483648, %v1147_v47 }
 0x1bc   :  { %679 = vst.msk [vmem:[%s1253_s7 + $0x50] sm:$0xff] %vm668_vm3, %v591_v61  ;;  %v504_v1 = vmul.f32 %v786_v60, %v1134_v30  ;;  %v788_v2 = vpop.eup %787  ;;  %v496_v3 = vsel %vm495_vm1, %v780_v36, %v492_v62  ;;  %v597_v7 = vadd.f32 %v784_v48, %v596_v0  ;;  %vm509_vm7 = vweird.f32 %v786_v60 }
 0x1bd   :  { %v501_v6 = vsel %vm1150_vm14, %v500_v52, %v496_v3  ;;  %v1174_v9 = vadd.f32 1.0, %v788_v2  ;;  %v790_v10 = vpop.eup %789  ;;  %vm510_vm10 = vmor %vm508_vm8, %vm509_vm7  ;;  %vm613_vm12 = vweird.f32 %v1147_v47  ;;  %vm618_vm14 = vcmp.eq.f32.partialorder %v617_v24, 8.507059e+37 }
 0x1be   :  { %v505_v8 = vsub.f32 1.0, %v504_v1  ;;  %673 = vst.msk [vmem:[%s1253_s7 + $0x20] sm:$0xff] %vm668_vm3, %v501_v6  ;;  %v601_v13 = vsel %vm600_vm5, %v784_v48, %v597_v7  ;;  %v609_v15 = vmul.f32 %v790_v10, %v1147_v47  ;;  %v792_v16 = vpop.eup %791  ;;  %v361_v18 = vpop.f32.mrf.mxu3  ;;  %vm614_vm11 = vweird.f32 %v790_v10 }
 0x1bf   :  { %v606_v17 = vsel %vm603_vm6, %v605_v11, %v601_v13  ;;  %797 = vrcp.f32 %v1174_v9  ;;  %v425_v21 = vadd.f32 1.0, %v792_v16  ;;  %v794_v22 = vpop.eup %793  ;;  %v362_v28 = vadd.f32 %v1042_v38, %v361_v18  ;;  %vm615_vm13 = vmor %vm613_vm12, %vm614_vm11 }
 0x1c0   :  { %v506_v14 = vmul.f32 %v786_v60, %v505_v8  ;;  %680 = vst.msk [vmem:[%s1253_s7 + $0x58] sm:$0xff] %vm668_vm3, %v606_v17  ;;  %v610_v20 = vsub.f32 1.0, %v609_v15  ;;  %v1196_v32 = vadd.f32 1.0, %v794_v22  ;;  %v620_v37 = vor.u32 1.1754944e-38, %v619_v25 }
 0x1c1   :  { %799 = vrcp.f32 %v425_v21  ;;  %v796_v29 = vpop.eup %795  ;;  %v704_v40 = vmul.f32 -1.442695, %v362_v28  ;;  %v527_v44 = vand.u32 2147483647, %v1174_v9  ;;  %v529_v45 = vand.u32 2147483648, %v1174_v9 }
 0x1c2   :  { %v507_v19 = vadd.f32 %v786_v60, %v506_v14  ;;  %v611_v27 = vmul.f32 %v790_v10, %v610_v20  ;;  %v1198_v34 = vadd.f32 1.0, %v796_v29  ;;  %801 = vrcp.f32 %v1196_v32 }
 0x1c3   :  { %v632_v48 = vand.u32 2147483647, %v425_v21  ;;  %vm523_vm0 = vweird.f32 %v1174_v9  ;;  %v634_v35 = vand.u32 2147483648, %v425_v21  ;;  %v530_v51 = vor.u32 1.1754944e-38, %v529_v45 }
 0x1c4   :  { %v511_v26 = vsel %vm510_vm10, %v786_v60, %v507_v19  ;;  %v612_v31 = vadd.f32 %v790_v10, %v611_v27  ;;  %803 = vrcp.f32 %v1198_v34  ;;  %vm528_vm4 = vcmp.eq.f32.partialorder %v527_v44, 8.507059e+37 }
 0x1c5   :  { %v516_v30 = vsel %vm513_vm9, %v515_v23, %v511_v26  ;;  %v798_v36 = vpop.eup %797  ;;  %805 = vpow2.f32 %v704_v40  ;;  %vm628_vm5 = vweird.f32 %v425_v21  ;;  %vm1212_vm6 = vcmp.eq.f32.partialorder %v632_v48, 8.507059e+37 }
 0x1c6   :  { %674 = vst.msk [vmem:[%s1253_s7 + $0x28] sm:$0xff] %vm668_vm3, %v516_v30  ;;  %v616_v38 = vsel %vm615_vm13, %v790_v10, %v612_v31  ;;  %v519_v39 = vmul.f32 %v798_v36, %v1174_v9  ;;  %vm524_vm15 = vweird.f32 %v798_v36  ;;  %v635_v62 = vor.u32 1.1754944e-38, %v634_v35 }
 0x1c7   :  { %v621_v41 = vsel %vm618_vm14, %v620_v37, %v616_v38  ;;  %v800_v42 = vpop.eup %799  ;;  %vm525_vm1 = vmor %vm523_vm0, %vm524_vm15  ;;  %v542_v63 = vand.u32 2147483647, %v1196_v32  ;;  %v544_v0 = vand.u32 2147483648, %v1196_v32  ;;  %vm538_vm9 = vweird.f32 %v1196_v32 }
 0x1c8   :  { %681 = vst.msk [vmem:[%s1253_s7 + $0x60] sm:$0xff] %vm668_vm3, %v621_v41  ;;  %v520_v43 = vsub.f32 1.0, %v519_v39  ;;  %v624_v46 = vmul.f32 %v800_v42, %v425_v21  ;;  %v802_v33 = vpop.eup %801  ;;  %vm629_vm2 = vweird.f32 %v800_v42  ;;  %v647_v6 = vand.u32 2147483647, %v1198_v34 }
 0x1c9   :  { %v534_v53 = vmul.f32 %v802_v33, %v1196_v32  ;;  %vm630_vm7 = vmor %vm628_vm5, %vm629_vm2  ;;  %vm539_vm8 = vweird.f32 %v802_v33  ;;  %v649_v7 = vand.u32 2147483648, %v1198_v34  ;;  %v545_v10 = vor.u32 1.1754944e-38, %v544_v0 }
 0x1ca   :  { %v521_v47 = vmul.f32 %v798_v36, %v520_v43  ;;  %v625_v49 = vsub.f32 1.0, %v624_v46  ;;  %v804_v54 = vpop.eup %803  ;;  %vm540_vm11 = vmor %vm538_vm9, %vm539_vm8  ;;  %vm543_vm12 = vcmp.eq.f32.partialorder %v542_v63, 8.507059e+37  ;;  %vm643_vm13 = vweird.f32 %v1198_v34 }
 0x1cb   :  { %v535_v59 = vsub.f32 1.0, %v534_v53  ;;  %v639_v60 = vmul.f32 %v804_v54, %v1198_v34  ;;  %v806_v61 = vpop.eup %805  ;;  %vm644_vm10 = vweird.f32 %v804_v54  ;;  %v650_v14 = vor.u32 1.1754944e-38, %v649_v7 }
 0x1cc   :  { %v522_v50 = vadd.f32 %v798_v36, %v521_v47  ;;  %v626_v52 = vmul.f32 %v800_v42, %v625_v49  ;;  %v427_v4 = vadd.f32 1.0, %v806_v61  ;;  %vm645_vm14 = vmor %vm643_vm13, %vm644_vm10  ;;  %vm648_vm15 = vcmp.eq.f32.partialorder %v647_v6, 8.507059e+37 }
 0x1cd   :  { %v536_v2 = vmul.f32 %v802_v33, %v535_v59  ;;  %v640_v3 = vsub.f32 1.0, %v639_v60 }
 0x1ce   :  { %v526_v55 = vsel %vm525_vm1, %v798_v36, %v522_v50  ;;  %v627_v58 = vadd.f32 %v800_v42, %v626_v52  ;;  %807 = vrcp.f32 %v427_v4  ;;  %v664_v20 = vand.u32 2147483648, %v427_v4 }
 0x1cf   :  { %v531_v57 = vsel %vm528_vm4, %v530_v51, %v526_v55  ;;  %v537_v8 = vadd.f32 %v802_v33, %v536_v2  ;;  %v641_v9 = vmul.f32 %v804_v54, %v640_v3  ;;  %v662_v22 = vand.u32 2147483647, %v427_v4 }
 0x1d0   :  { %675 = vst.msk [vmem:[%s1253_s7 + $0x30] sm:$0xff] %vm668_vm3, %v531_v57  ;;  %v631_v1 = vsel %vm630_vm7, %v800_v42, %v627_v58  ;;  %vm658_vm1 = vweird.f32 %v427_v4  ;;  %v665_v24 = vor.u32 1.1754944e-38, %v664_v20 }
 0x1d1   :  { %v636_v5 = vsel %vm1212_vm6, %v635_v62, %v631_v1  ;;  %v541_v11 = vsel %vm540_vm11, %v802_v33, %v537_v8  ;;  %v642_v12 = vadd.f32 %v804_v54, %v641_v9  ;;  %vm663_vm4 = vcmp.eq.f32.partialorder %v662_v22, 8.507059e+37 }
 0x1d2   :  { %682 = vst.msk [vmem:[%s1253_s7 + $0x68] sm:$0xff] %vm668_vm3, %v636_v5  ;;  %v546_v13 = vsel %vm543_vm12, %v545_v10, %v541_v11 }
 0x1d3   :  { %676 = vst.msk [vmem:[%s1253_s7 + $0x38] sm:$0xff] %vm668_vm3, %v546_v13  ;;  %v646_v15 = vsel %vm645_vm14, %v804_v54, %v642_v12 }
 0x1d4   :  { %v651_v16 = vsel %vm648_vm15, %v650_v14, %v646_v15  ;;  %v808_v17 = vpop.eup %807 }
 0x1d5   :  { %683 = vst.msk [vmem:[%s1253_s7 + $0x70] sm:$0xff] %vm668_vm3, %v651_v16  ;;  %v654_v18 = vmul.f32 %v808_v17, %v427_v4  ;;  %vm659_vm0 = vweird.f32 %v808_v17 }
 0x1d6   :  { %vm660_vm2 = vmor %vm658_vm1, %vm659_vm0 }
 0x1d7   :  { %v655_v19 = vsub.f32 1.0, %v654_v18 }
 0x1d9   :  { %v656_v21 = vmul.f32 %v808_v17, %v655_v19 }
 0x1db   :  { %v657_v23 = vadd.f32 %v808_v17, %v656_v21 }
 0x1dd   :  { %v661_v25 = vsel %vm660_vm2, %v808_v17, %v657_v23 }
 0x1de   :  { %v666_v26 = vsel %vm663_vm4, %v665_v24, %v661_v25 }
 0x1df   :  { %684 = vst.msk [vmem:[%s1253_s7 + $0x78] sm:$0xff] %vm668_vm3, %v666_v26 }

</bundles_post_ra>
